<compile_context>
chip_gen: v5e
topology: v5e:2x2
jax: 0.10.0
libtpu: 0.0.40
codegen_flags: <defaults>
</compile_context>

<pallas_src>
import jax
import jax.numpy as jnp
from jax.experimental import pallas as pl
from jax.experimental.pallas import tpu as pltpu

# ----------------------------- VP-SDE (glue) ---------------------------------
BETA_0 = 0.1
BETA_1 = 20.0


def _vpsde_coeffs(t):
    """Scalar (per-batch) VP-SDE coefficients."""
    lmc = -0.25 * t ** 2 * (BETA_1 - BETA_0) - 0.5 * t * BETA_0   # log mean coeff
    mean_coeff = jnp.exp(lmc)
    std = jnp.sqrt(1.0 - jnp.exp(2.0 * lmc))
    g2 = BETA_0 + t * (BETA_1 - BETA_0)                           # likelihood weighting g(t)^2
    return mean_coeff, std, g2


def _pick_batch_tile(n, c, hw, itemsize=4,
                     per_input_budget_bytes=4 * 1024 * 1024, max_unroll=64):
    """Largest divisor of n whose (nb, c, hw) f32 block stays within a per-input
    VMEM budget (2 inputs x 2 pipeline buffers x 4 MiB << 32 MiB scoped VMEM,
    safe on v5e/v6e/v7x)."""
    max_nb = max(1, per_input_budget_bytes // (c * hw * itemsize))
    max_nb = min(max_nb, max_unroll)
    nb = 1
    for cand in range(1, n + 1):
        if n % cand == 0 and cand <= max_nb:
            nb = cand
    return nb


# ------------------------------- Pallas kernel --------------------------------
def _make_kernel(l_type, reduce_strategy, weighting, nb, hw, denom):
    def kernel(scal_ref, x0_ref, eps_ref, w_ref, out_ref, acc_ref):
        g = pl.program_id(0)

        @pl.when(g == 0)
        def _init():
            acc_ref[...] = jnp.zeros_like(acc_ref)

        # Per-batch scalar scaling (coefficients already carry the time scale
        # and, for nll, sqrt(likelihood weight)); concatenate along lanes so the
        # score-net contraction is a single lane-dense matmul.
        x_pieces = []
        e_pieces = []
        for j in range(nb):                      # static unroll, nb small
            idx = g * nb + j
            a = scal_ref[0, idx]                 # = w * (1+0.1t) * mean_coeff
            b = scal_ref[1, idx]                 # = w * (1+0.1t) * std
            x0j = x0_ref[j]                      # (C, HW)
            epj = eps_ref[j]                     # (C, HW)
            x_pieces.append(a * x0j + b * epj)
            if weighting == 'nll':
                cfold = scal_ref[2, idx]         # = sqrt(g(t)^2)/std
                e_pieces.append(cfold * epj)
            else:
                e_pieces.append(epj)

        if nb > 1:
            xs = jnp.concatenate(x_pieces, axis=1)   # (C, nb*HW)
            et = jnp.concatenate(e_pieces, axis=1)   # (C, nb*HW)
        else:
            xs = x_pieces[0]
            et = e_pieces[0]

        # Stand-in score_fn: one wide channel-mixing matmul per grid step.
        # (On v5e a VPU channel-mix could replace this tiny-C MXU dot; the wide
        #  lane-dense dot is kept for simplicity across generations.)
        pred = jnp.dot(w_ref[...], xs, preferred_element_type=jnp.float32)

        diff = et - pred
        if weighting == 'nll' or l_type == 'l2':
            elem = diff * diff
        else:                                    # fid + l1
            elem = jnp.abs(diff)

        # Accumulate into VMEM scratch; HBM output written once at the end.
        acc_ref[...] += jnp.sum(elem, keepdims=True)

        @pl.when(g == pl.num_programs(0) - 1)
        def _finalize():
            if reduce_strategy == 'mean':
                out_ref[...] = acc_ref[...] * (1.0 / denom)
            else:
                out_ref[...] = acc_ref[...]

    return kernel


def score_loss_pallas(x_0, t, eps, w_score, *, weighting='nll', l_type='l2',
                      reduce_strategy='mean'):
    """Pallas implementation of ScoreLoss.forward (score_fn = channel-matmul stand-in)."""
    assert weighting in ('nll', 'fid')
    if weighting == 'nll' and l_type != 'l2':
        raise ValueError('l_type can only be `l2` when using nll weighting')

    n, c, h, wdim = x_0.shape
    hw = h * wdim
    x0f = x_0.reshape(n, c, hw).astype(jnp.float32)
    epsf = eps.reshape(n, c, hw).astype(jnp.float32)
    t = t.astype(jnp.float32)

    # --- scalar glue (per-batch coefficients, folded) ---
    mean_coeff, std, g2 = _vpsde_coeffs(t)
    s = 1.0 + 0.1 * t                     # stand-in score-net time scale, folded in
    if weighting == 'nll':
        cfold = jnp.sqrt(g2) / std        # sqrt of likelihood weight g^2/std^2 (f32)
    else:
        cfold = jnp.ones_like(t)
    a = cfold * s * mean_coeff
    b = cfold * s * std
    scal = jnp.stack([a, b, cfold], axis=0)   # (3, N): long axis last for SMEM

    nb = _pick_batch_tile(n, c, hw)
    denom = float(n * c * hw)
    kernel = _make_kernel(l_type, reduce_strategy, weighting, nb, hw, denom)

    grid = (n // nb,)
    grid_spec = pltpu.PrefetchScalarGridSpec(
        num_scalar_prefetch=0,
        grid=grid,
        in_specs=[
            pl.BlockSpec(memory_space=pltpu.MemorySpace.SMEM),      # (3, N) scalar table
            pl.BlockSpec((nb, c, hw), lambda g: (g, 0, 0)),         # x_0 batch block
            pl.BlockSpec((nb, c, hw), lambda g: (g, 0, 0)),         # eps batch block
            pl.BlockSpec((c, c), lambda g: (0, 0)),                 # score-net weight
        ],
        out_specs=pl.BlockSpec((1, 1), lambda g: (0, 0)),           # scalar loss
        scratch_shapes=[pltpu.VMEM((1, 1), jnp.float32)],           # loss accumulator
    )

    flops = 2 * n * c * c * hw + 6 * n * c * hw
    bytes_accessed = 4 * (2 * n * c * hw + c * c + 3 * n + 1)

    out = pl.pallas_call(
        kernel,
        grid_spec=grid_spec,
        out_shape=jax.ShapeDtypeStruct((1, 1), jnp.float32),
        compiler_params=pltpu.CompilerParams(
            dimension_semantics=("arbitrary",),       # grid axis carries the accumulator
            vmem_limit_bytes=32 * 1024 * 1024),
        cost_estimate=pl.CostEstimate(
            flops=flops, transcendentals=0, bytes_accessed=bytes_accessed),
    )(scal, x0f, epsf, w_score.astype(jnp.float32))
    return out[0, 0]


# --------------------------- pure-JAX reference -------------------------------
def score_loss_ref(x_0, t, eps, w_score, *, weighting='nll', l_type='l2',
                   reduce_strategy='mean'):
    mean_coeff, std, g2 = _vpsde_coeffs(t)
    mc = mean_coeff[:, None, None, None]
    sd = std[:, None, None, None]
    x_t = mc * x_0 + sd * eps
    eps_pred = jnp.einsum('oc,nchw->nohw', w_score, x_t) \
        * (1.0 + 0.1 * t)[:, None, None, None]
    red = jnp.mean if reduce_strategy == 'mean' else jnp.sum
    if weighting == 'nll':
        gt_score = -eps / sd
        pred_score = -eps_pred / sd
        loss = (pred_score - gt_score) ** 2 * g2[:, None, None, None]
        return red(loss)
    diff = eps - eps_pred
    elem = diff ** 2 if l_type == 'l2' else jnp.abs(diff)
    return red(elem)


# ----------------------------------- main --------------------------------------
if __name__ == "__main__":
    key = jax.random.PRNGKey(0)
    kx, ke, kt, kw = jax.random.split(key, 4)

    N, C, H, W = 2, 8, 16, 16
    x_0 = jax.random.normal(kx, (N, C, H, W), dtype=jnp.float32)
    eps = jax.random.normal(ke, (N, C, H, W), dtype=jnp.float32)
    t = jax.random.uniform(kt, (N,), minval=0.1, maxval=1.0, dtype=jnp.float32)
    # deterministic stand-in score-net parameters (1x1 conv over channels)
    w_score = 0.1 * jax.random.normal(kw, (C, C), dtype=jnp.float32)

    configs = [
        ('nll', 'l2', 'mean'),
        ('nll', 'l2', 'sum'),
        ('fid', 'l2', 'mean'),
        ('fid', 'l1', 'mean'),
    ]
    for weighting, l_type, reduce_strategy in configs:
        got = jax.block_until_ready(
            score_loss_pallas(x_0, t, eps, w_score,
                              weighting=weighting, l_type=l_type,
                              reduce_strategy=reduce_strategy))
        want = score_loss_ref(x_0, t, eps, w_score,
                              weighting=weighting, l_type=l_type,
                              reduce_strategy=reduce_strategy)
        assert jnp.allclose(got, want, rtol=1e-4, atol=1e-5), (
            weighting, l_type, reduce_strategy, got, want)

    print("KERNEL_OK")
</pallas_src>

<mosaic_0001>
module attributes {stable_mosaic.version = 11 : i64} {
  func.func @kernel(%arg0: i32, %arg1: memref<3x2xf32, #tpu.memory_space<smem>>, %arg2: memref<2x8x256xf32, #tpu.memory_space<vmem>>, %arg3: memref<2x8x256xf32, #tpu.memory_space<vmem>>, %arg4: memref<8x8xf32, #tpu.memory_space<vmem>>, %arg5: memref<1x1xf32, #tpu.memory_space<vmem>>, %arg6: memref<1x1xf32, #tpu.memory_space<vmem>>) attributes {dimension_semantics = [#tpu.dimension_semantics<arbitrary>], iteration_bounds = array<i64: 1>, scalar_prefetch = 0 : i64, scratch_operands = 1 : i64, tpu.core_type = #tpu.core_type<tc>, window_params = [{transform_indices = @transform_0, window_bounds = array<i64: 3, 2>}, {transform_indices = @transform_1, window_bounds = array<i64: 2, 8, 256>}, {transform_indices = @transform_2, window_bounds = array<i64: 2, 8, 256>}, {pipeline_mode = #tpu.pipeline_mode<synchronous>, transform_indices = @transform_3, window_bounds = array<i64: 8, 8>}, {pipeline_mode = #tpu.pipeline_mode<synchronous>, transform_indices = @transform_4, window_bounds = array<i64: 1, 1>}]} {
    %c0_i32 = arith.constant 0 : i32
    %0 = arith.cmpi eq, %arg0, %c0_i32 : i32
    %1 = arith.extui %0 : i1 to i32
    %c0_i32_0 = arith.constant 0 : i32
    %2 = arith.cmpi ne, %1, %c0_i32_0 : i32
    scf.if %2 {
      %cst_27 = arith.constant 0.000000e+00 : f32
      %58 = vector.broadcast %cst_27 : f32 to vector<1x1xf32>
      %c0_28 = arith.constant 0 : index
      %c0_29 = arith.constant 0 : index
      %59 = vector.load %arg6[%c0_28, %c0_29] : memref<1x1xf32, #tpu.memory_space<vmem>>, vector<1x1xf32>
      tpu.vector_store %arg6[%c0_28, %c0_29], %58 {strides = array<i32>} : memref<1x1xf32, #tpu.memory_space<vmem>>, vector<1x1xf32>,
    } else {
    }
    %c2_i32 = arith.constant 2 : i32
    %3 = arith.muli %arg0, %c2_i32 : i32
    %c0_i32_1 = arith.constant 0 : i32
    %4 = arith.addi %3, %c0_i32_1 : i32
    %c0 = arith.constant 0 : index
    %5 = arith.index_cast %4 : i32 to index
    %6 = memref.load %arg1[%c0, %5] : memref<3x2xf32, #tpu.memory_space<smem>>
    %c1 = arith.constant 1 : index
    %7 = arith.index_cast %4 : i32 to index
    %8 = memref.load %arg1[%c1, %7] : memref<3x2xf32, #tpu.memory_space<smem>>
    %c0_2 = arith.constant 0 : index
    %c0_3 = arith.constant 0 : index
    %c0_4 = arith.constant 0 : index
    %9 = vector.load %arg2[%c0_2, %c0_3, %c0_4] : memref<2x8x256xf32, #tpu.memory_space<vmem>>, vector<1x8x256xf32>
    %10 = vector.shape_cast %9 : vector<1x8x256xf32> to vector<8x256xf32>
    %c0_5 = arith.constant 0 : index
    %c0_6 = arith.constant 0 : index
    %c0_7 = arith.constant 0 : index
    %11 = vector.load %arg3[%c0_5, %c0_6, %c0_7] : memref<2x8x256xf32, #tpu.memory_space<vmem>>, vector<1x8x256xf32>
    %12 = vector.shape_cast %11 : vector<1x8x256xf32> to vector<8x256xf32>
    %13 = vector.broadcast %6 : f32 to vector<8x256xf32>
    %14 = arith.mulf %13, %10 : vector<8x256xf32>
    %15 = vector.broadcast %8 : f32 to vector<8x256xf32>
    %16 = arith.mulf %15, %12 : vector<8x256xf32>
    %17 = arith.addf %14, %16 : vector<8x256xf32>
    %c2 = arith.constant 2 : index
    %18 = arith.index_cast %4 : i32 to index
    %19 = memref.load %arg1[%c2, %18] : memref<3x2xf32, #tpu.memory_space<smem>>
    %20 = vector.broadcast %19 : f32 to vector<8x256xf32>
    %21 = arith.mulf %20, %12 : vector<8x256xf32>
    %c2_i32_8 = arith.constant 2 : i32
    %22 = arith.muli %arg0, %c2_i32_8 : i32
    %c1_i32 = arith.constant 1 : i32
    %23 = arith.addi %22, %c1_i32 : i32
    %c0_9 = arith.constant 0 : index
    %24 = arith.index_cast %23 : i32 to index
    %25 = memref.load %arg1[%c0_9, %24] : memref<3x2xf32, #tpu.memory_space<smem>>
    %c1_10 = arith.constant 1 : index
    %26 = arith.index_cast %23 : i32 to index
    %27 = memref.load %arg1[%c1_10, %26] : memref<3x2xf32, #tpu.memory_space<smem>>
    %c1_11 = arith.constant 1 : index
    %c0_12 = arith.constant 0 : index
    %c0_13 = arith.constant 0 : index
    %28 = vector.load %arg2[%c1_11, %c0_12, %c0_13] : memref<2x8x256xf32, #tpu.memory_space<vmem>>, vector<1x8x256xf32>
    %29 = vector.shape_cast %28 : vector<1x8x256xf32> to vector<8x256xf32>
    %c1_14 = arith.constant 1 : index
    %c0_15 = arith.constant 0 : index
    %c0_16 = arith.constant 0 : index
    %30 = vector.load %arg3[%c1_14, %c0_15, %c0_16] : memref<2x8x256xf32, #tpu.memory_space<vmem>>, vector<1x8x256xf32>
    %31 = vector.shape_cast %30 : vector<1x8x256xf32> to vector<8x256xf32>
    %32 = vector.broadcast %25 : f32 to vector<8x256xf32>
    %33 = arith.mulf %32, %29 : vector<8x256xf32>
    %34 = vector.broadcast %27 : f32 to vector<8x256xf32>
    %35 = arith.mulf %34, %31 : vector<8x256xf32>
    %36 = arith.addf %33, %35 : vector<8x256xf32>
    %c2_17 = arith.constant 2 : index
    %37 = arith.index_cast %23 : i32 to index
    %38 = memref.load %arg1[%c2_17, %37] : memref<3x2xf32, #tpu.memory_space<smem>>
    %39 = vector.broadcast %38 : f32 to vector<8x256xf32>
    %40 = arith.mulf %39, %31 : vector<8x256xf32>
    %41 = tpu.concatenate %17, %36 in 1 : vector<8x256xf32>, vector<8x256xf32> -> vector<8x512xf32>
    %42 = tpu.concatenate %21, %40 in 1 : vector<8x256xf32>, vector<8x256xf32> -> vector<8x512xf32>
    %c0_18 = arith.constant 0 : index
    %c0_19 = arith.constant 0 : index
    %43 = vector.load %arg4[%c0_18, %c0_19] : memref<8x8xf32, #tpu.memory_space<vmem>>, vector<8x8xf32>
    %cst = arith.constant dense<0.000000e+00> : vector<8x512xf32>
    %44 = tpu.matmul %43, %41, %cst {dimension_numbers = #tpu.dot_dimension_numbers<[1], [0], [0], [1], [0, 0, 1, 1], [], []>} : vector<8x8xf32>, vector<8x512xf32>, vector<8x512xf32> -> vector<8x512xf32>
    %45 = arith.subf %42, %44 : vector<8x512xf32>
    %46 = arith.mulf %45, %45 : vector<8x512xf32>
    %c0_20 = arith.constant 0 : index
    %c0_21 = arith.constant 0 : index
    %47 = vector.load %arg6[%c0_20, %c0_21] : memref<1x1xf32, #tpu.memory_space<vmem>>, vector<1x1xf32>
    %48 = vector.shape_cast %46 : vector<8x512xf32> to vector<1x8x512xf32>
    %cst_22 = arith.constant dense<0.000000e+00> : vector<1xf32>
    %49 = vector.multi_reduction <add>, %48, %cst_22 [1, 2] : vector<1x8x512xf32> to vector<1xf32>
    %50 = vector.shape_cast %49 : vector<1xf32> to vector<1x1x1xf32>
    %51 = vector.extract %50[0, 0, 0] : f32 from vector<1x1x1xf32>
    %52 = vector.broadcast %51 : f32 to vector<1x1xf32>
    %53 = arith.addf %47, %52 : vector<1x1xf32>
    %c0_23 = arith.constant 0 : index
    %c0_24 = arith.constant 0 : index
    %54 = vector.load %arg6[%c0_23, %c0_24] : memref<1x1xf32, #tpu.memory_space<vmem>>, vector<1x1xf32>
    tpu.vector_store %arg6[%c0_23, %c0_24], %53 {strides = array<i32>} : memref<1x1xf32, #tpu.memory_space<vmem>>, vector<1x1xf32>,
    %c0_i32_25 = arith.constant 0 : i32
    %55 = arith.cmpi eq, %arg0, %c0_i32_25 : i32
    %56 = arith.extui %55 : i1 to i32
    %c0_i32_26 = arith.constant 0 : i32
    %57 = arith.cmpi ne, %56, %c0_i32_26 : i32
    scf.if %57 {
      %c0_27 = arith.constant 0 : index
      %c0_28 = arith.constant 0 : index
      %58 = vector.load %arg6[%c0_27, %c0_28] : memref<1x1xf32, #tpu.memory_space<vmem>>, vector<1x1xf32>
      %cst_29 = arith.constant 2.44140625E-4 : f32
      %59 = vector.broadcast %cst_29 : f32 to vector<1x1xf32>
      %60 = arith.mulf %58, %59 : vector<1x1xf32>
      %c0_30 = arith.constant 0 : index
      %c0_31 = arith.constant 0 : index
      %61 = vector.load %arg5[%c0_30, %c0_31] : memref<1x1xf32, #tpu.memory_space<vmem>>, vector<1x1xf32>
      tpu.vector_store %arg5[%c0_30, %c0_31], %60 {strides = array<i32>} : memref<1x1xf32, #tpu.memory_space<vmem>>, vector<1x1xf32>,
    } else {
    }
    return
  }
  func.func @transform_0(%arg0: i32) -> (i32, i32) {
    %c0_i32 = arith.constant 0 : i32
    %c0_i32_0 = arith.constant 0 : i32
    %c0_i32_1 = arith.constant 0 : i32
    return %c0_i32, %c0_i32_0 : i32, i32
  }
  func.func @transform_1(%arg0: i32) -> (i32, i32, i32) {
    %c0_i32 = arith.constant 0 : i32
    %c0_i32_0 = arith.constant 0 : i32
    %c0_i32_1 = arith.constant 0 : i32
    return %arg0, %c0_i32, %c0_i32_0 : i32, i32, i32
  }
  func.func @transform_2(%arg0: i32) -> (i32, i32, i32) {
    %c0_i32 = arith.constant 0 : i32
    %c0_i32_0 = arith.constant 0 : i32
    %c0_i32_1 = arith.constant 0 : i32
    return %arg0, %c0_i32, %c0_i32_0 : i32, i32, i32
  }
  func.func @transform_3(%arg0: i32) -> (i32, i32) {
    %c0_i32 = arith.constant 0 : i32
    %c0_i32_0 = arith.constant 0 : i32
    %c0_i32_1 = arith.constant 0 : i32
    return %c0_i32, %c0_i32_0 : i32, i32
  }
  func.func @transform_4(%arg0: i32) -> (i32, i32) {
    %c0_i32 = arith.constant 0 : i32
    %c0_i32_0 = arith.constant 0 : i32
    %c0_i32_1 = arith.constant 0 : i32
    return %c0_i32, %c0_i32_0 : i32, i32
  }
}

</mosaic_0001>

<bundles_post_ra>
// kernel: tpu_custom_call.1
= control target key start
LH: loop header
LB: loop body
LE: loop exit
PB: predicated region body
PF: predicated region fallthrough
CT: control target
= control target key end

     0   :  { %9 = vsyncpa [#allocation6], 0  ;;  %s428_s0 = inlined_call_operand.vmem [shape: f32[3,2], index: 0, kind: input, shape index: {}]   ;;  %s429_s1 = inlined_call_operand.hbm [shape: f32[2,8,256], index: 1, kind: input, shape index: {}]   ;;  %s430_s2 = inlined_call_operand.hbm [shape: f32[2,8,256], index: 2, kind: input, shape index: {}]   ;;  %s431_s3 = inlined_call_operand.vmem [shape: f32[8,8], index: 3, kind: input, shape index: {}]   ;;  %s432_s4 = inlined_call_operand.hbm [shape: f32[1,1], index: 4, kind: output, shape index: {}]  }
   0x1   :  { %10 = vsyncpa [#allocation4], 0 }
   0x2   :  { %11 = vsyncpa [#allocation9], 0 }
   0x3   :  { %12 = vsyncpa [#allocation5], 0  ;;  %s18_s17 = sshll.u32 %s428_s0, 4  ;;  %s26_s20 = sshll.u32 %s429_s1, 4  ;;  %s19_s17 = int_to_ptr.vmem [resolvable:$true] %s18_s17  ;;  %s27_s20 = int_to_ptr.hbm [resolvable:$true] %s26_s20 }
   0x4   :  { %s374_s21 = smov [#allocation3]   ;;  %s375_s22 = smov [#allocation7]  }
   0x5   :  { %21 = dma.vmem_to_smem %s19_s17, 64, %s374_s21, [#allocation6]  }
   0x6   :  { %s28_s23 = sshll.u32 %s375_s22, 4  ;;  %s376_s24 = smov 256   ;;  %s29_s23 = int_to_ptr.vmem [resolvable:$true] %s28_s23 }
   0x7   :  { %s377_s25 = smov 16   ;;  %s39_s28 = sshll.u32 %s430_s2, 4  ;;  %s40_s28 = int_to_ptr.hbm [resolvable:$true] %s39_s28 }
   0x8   :  { %34 = dma.hbm_to_vmem [thread:$0]  %s27_s20, 512, %s29_s23, [#allocation4], %s376_s24, %s376_s24, %s377_s25  }
   0x9   :  { %s378_s0 = smov [#allocation8]  }
   0xa   :  { %s41_s29 = sshll.u32 %s378_s0, 4  ;;  %s42_s29 = int_to_ptr.vmem [resolvable:$true] %s41_s29 }
   0xb   :  { %47 = dma.hbm_to_vmem [thread:$0]  %s40_s28, 512, %s42_s29, [#allocation9], %s376_s24, %s376_s24, %s377_s25  }
   0xc   :  { %366 = dma.done.wait [#allocation6], 64  }
   0xd   :  { %367 = vsyncadd [#allocation6], 4294967232 }
   0xe   :  { %368 = dma.done.wait [#allocation4], 512  }
   0xf   :  { %369 = vsyncadd [#allocation4], 4294966784 }
  0x10   :  { %370 = dma.done.wait [#allocation9], 512  }
  0x11   :  { %371 = vsyncadd [#allocation9], 4294966784 }
  0x12   :  { %62 = sfence }
  0x13   :  { %s266_s1 = sld [smem:[#allocation3 + $0x1]]  ;;  %v109_v0 = vld [vmem:[#allocation7 + $0x10] sm:$0xff]  ;;  %v110_v1 = vld [vmem:[#allocation7 + $0x18] sm:$0xff]  ;;  %v79_v5 = vld [vmem:[#allocation7] sm:$0xff]  ;;  %vm130_vm0 = vcmask 64512   ;;  %vm67_vm1 = vcmask 0  }
  0x14   :  { %s267_s30 = sld [smem:[#allocation3 + $0x81]]  ;;  %v112_v2 = vld [vmem:[#allocation8 + $0x10] sm:$0xff]  ;;  %v113_v3 = vld [vmem:[#allocation8 + $0x18] sm:$0xff]  ;;  %v80_v6 = vld [vmem:[#allocation7 + $0x8] sm:$0xff]  ;;  %v379_v46 = vmov 0.0   ;;  %s380_s10 = smov [#allocation10]  }
  0x15   :  { %s70_s5 = sld [smem:[#allocation3]]  ;;  %v81_v10 = vld [vmem:[#allocation8] sm:$0xff]  ;;  %v82_v11 = vld [vmem:[#allocation8 + $0x8] sm:$0xff]  ;;  %v129_v19 = vld [vmem:[%s431_s3] sm:$0xff]  ;;  %68 = vst.msk [vmem:[#allocation2] sm:$0x1] %vm67_vm1, %v379_v46 }
  0x16   :  { %s264_s6 = sld [smem:[#allocation3 + $0x80]]  ;;  %s250_s11 = sshll.u32 %s380_s10, 4  ;;  %s251_s11 = int_to_ptr.vmem [resolvable:$true] %s250_s11 }
  0x17   :  { %s265_s8 = sld [smem:[#allocation3 + $0x100]]  ;;  %s252_s14 = sshll.u32 %s432_s4, 4  ;;  %s253_s14 = int_to_ptr.hbm [resolvable:$true] %s252_s14 }
  0x18   :  { %s268_s9 = sld [smem:[#allocation3 + $0x101]] }
  0x19   :  { %v114_v4 = vstv %s266_s1 }
  0x1a   :  { %v115_v7 = vmul.f32 %v114_v4, %v109_v0  ;;  %v117_v8 = vstv %s267_s30  ;;  %v116_v9 = vmul.f32 %v114_v4, %v110_v1 }
  0x1b   :  { %v118_v12 = vmul.f32 %v117_v8, %v112_v2  ;;  %v119_v13 = vmul.f32 %v117_v8, %v113_v3  ;;  %v83_v14 = vstv %s70_s5 }
  0x1c   :  { %v84_v15 = vmul.f32 %v83_v14, %v79_v5  ;;  %v86_v16 = vstv %s264_s6  ;;  %v85_v17 = vmul.f32 %v83_v14, %v80_v6  ;;  %v222_v54 = vld [vmem:[#allocation2] sm:$0x1] }
  0x1d   :  { %v120_v18 = vadd.f32 %v118_v12, %v115_v7  ;;  %v121_v20 = vadd.f32 %v119_v13, %v116_v9  ;;  %v87_v21 = vmul.f32 %v86_v16, %v81_v10  ;;  %v88_v22 = vmul.f32 %v86_v16, %v82_v11 }
  0x1e   :  { %v95_v25 = vstv %s265_s8  ;;  %v126_v28 = vstv %s268_s9 }
  0x1f   :  { %189 = vmatpush.msra.mxu2 %v120_v18  ;;  %209 = vmatpush.msra.mxu3 %v121_v20  ;;  %v89_v23 = vadd.f32 %v87_v21, %v84_v15  ;;  %v90_v24 = vadd.f32 %v88_v22, %v85_v17  ;;  %v96_v26 = vmul.f32 %v95_v25, %v81_v10 }
  0x20   :  { %271 = vmatmul.msk.f32.vlgmr.msra.gmra.mxu2 %vm130_vm0, %v129_v19  ;;  %272 = vmatmul.msk.f32.vlgmr.msra.gmra.mxu3 %vm130_vm0, %v129_v19  ;;  %v97_v27 = vmul.f32 %v95_v25, %v82_v11  ;;  %v127_v33 = vmul.f32 %v126_v28, %v112_v2  ;;  %v128_v34 = vmul.f32 %v126_v28, %v113_v3 }
  0x21   :  { %149 = vmatpush.msra.mxu0 %v89_v23  ;;  %169 = vmatpush.msra.mxu1 %v90_v24 }
  0x22   :  { %269 = vmatmul.msk.f32.vlgmr.msra.gmra.mxu0 %vm130_vm0, %v129_v19  ;;  %270 = vmatmul.msk.f32.vlgmr.msra.gmra.mxu1 %vm130_vm0, %v129_v19 }
  0x9f   :  { %v151_v29 = vpop.f32.mrf.mxu0  ;;  %v171_v30 = vpop.f32.mrf.mxu1 }
  0xa0   :  { %v214_v31 = vsub.f32 %v96_v26, %v151_v29  ;;  %v215_v32 = vsub.f32 %v97_v27, %v171_v30 }
  0xa2   :  { %v218_v35 = vmul.f32 %v214_v31, %v214_v31  ;;  %v219_v36 = vmul.f32 %v215_v32, %v215_v32 }
  0xa3   :  { %v191_v37 = vpop.f32.mrf.mxu2  ;;  %v211_v38 = vpop.f32.mrf.mxu3 }
  0xa4   :  { %v223_v39 = vadd.f32 %v219_v36, %v218_v35  ;;  %v216_v40 = vsub.f32 %v127_v33, %v191_v37  ;;  %v217_v41 = vsub.f32 %v128_v34, %v211_v38 }
  0xa6   :  { %v220_v42 = vmul.f32 %v216_v40, %v216_v40  ;;  %v221_v43 = vmul.f32 %v217_v41, %v217_v41 }
  0xa8   :  { %v224_v44 = vadd.f32 %v223_v39, %v220_v42 }
  0xaa   :  { %v225_v45 = vadd.f32 %v224_v44, %v221_v43 }
  0xac   :  { %226 = vadd.xlane.f32.xlu0 %v225_v45 }
 0x11f   :  { %v227_v47 = vpop.xlane.xlu0 %226 }
 0x120   :  { %v228_v48 = vrot.slane %v227_v47, 4 }
 0x122   :  { %v229_v49 = vadd.f32 %v228_v48, %v227_v47 }
 0x124   :  { %v230_v50 = vrot.slane %v229_v49, 2 }
 0x126   :  { %v231_v51 = vadd.f32 %v230_v50, %v229_v49 }
 0x128   :  { %v232_v52 = vrot.slane %v231_v51, 1 }
 0x12a   :  { %v233_v53 = vadd.f32 %v232_v52, %v231_v51 }
 0x12c   :  { %273 = vpush %v233_v53 }
 0x15d   :  { %s274_s3 = spop %273 }
 0x15e   :  { %v235_v55 = vstv %s274_s3 }
 0x15f   :  { %v236_v56 = vadd.f32 %v235_v55, %v222_v54 }
 0x161   :  { %238 = vst.msk [vmem:[#allocation2] sm:$0x1] %vm67_vm1, %v236_v56 }
 0x168   :  { %v242_v57 = vld [vmem:[#allocation2] sm:$0x1] }
 0x169   :  { %v243_v58 = vmul.f32 0.00024414063, %v242_v57 }
 0x16b   :  { %244 = vst.msk [vmem:[#allocation10] sm:$0x1] %vm67_vm1, %v243_v58 }
 0x16c   :  { %255 = dma.vmem_to_hbm [thread:$0]  %s251_s11, 16, %s253_s14, [#allocation5]  }
 0x16d   :  { %372 = dma.done.wait [#allocation5], 16  }
 0x16e   :  { %373 = vsyncadd [#allocation5], 4294967280 }
 0x16f   :  { %260 = vsyncpa [#allocation4], 1 }
 0x170   :  { %261 = vsyncpa [#allocation9], 1 }
 0x171   :  { %262 = vsyncpa [#allocation5], 1 }
 0x172   :  { %263 = vsyncpa [#allocation6], 1 }

</bundles_post_ra>
